<compile_context>
chip_gen: v7x
topology: tpu7x:2x2x1
jax: 0.10.0
libtpu: 0.0.40
codegen_flags: <defaults>
</compile_context>

<pallas_src>
import functools

import jax
import jax.numpy as jnp
from jax.experimental import pallas as pl
from jax.experimental.pallas import tpu as pltpu

CR_LOSS_WEIGHT = 0.5          # deterministic hyperparameter from __init__
_NUM_PARTIALS = 2             # always emit 2 partials (v7x dual-TC; free elsewhere)
_LOGITS_TILE_BUDGET = 12 * 1024 * 1024   # bytes for 2 streams x 2 pipeline buffers


def _cr_loss_kernel(w_ref, s_ref, tgt_ref, out_ref, acc_ref, *,
                    cr_weight, batch, part_rows, block_rows, needs_mask):
    p = pl.program_id(0)          # partial index (parallel axis)
    i = pl.program_id(1)          # inner batch-tile index (arbitrary axis)

    @pl.when(i == 0)
    def _():
        acc_ref[0] = jnp.float32(0.0)

    w = w_ref[...].astype(jnp.float32)      # (TB, C) weak-aug logits
    s = s_ref[...].astype(jnp.float32)      # (TB, C) strong-aug logits
    tgt = tgt_ref[...]                      # (TB, 1) int32 class labels

    # --- log-softmax / softmax of weak logits (stable, exact) ---------------
    w_shift = w - jnp.max(w, axis=-1, keepdims=True)
    exp_w = jnp.exp(w_shift)
    sum_exp_w = jnp.sum(exp_w, axis=-1, keepdims=True)
    log_p_w = w_shift - jnp.log(sum_exp_w)                       # (TB, C)
    p_w = exp_w / sum_exp_w                                      # softmax(preds_w)

    # --- log-softmax of strong logits ---------------------------------------
    s_shift = s - jnp.max(s, axis=-1, keepdims=True)
    log_p_s = s_shift - jnp.log(jnp.sum(jnp.exp(s_shift), axis=-1, keepdims=True))

    # --- per-row cross-entropy with integer targets (no one-hot stream) -----
    col = jax.lax.broadcasted_iota(jnp.int32, w.shape, 1)        # (TB, C)
    tmask = col == tgt                                           # broadcast (TB, 1)
    ce_row = -jnp.sum(jnp.where(tmask, log_p_w, 0.0), axis=-1, keepdims=True)

    # --- per-row KL(p_w || softmax(preds_s)) ---------------------------------
    kl_row = jnp.sum(p_w * (log_p_w - log_p_s), axis=-1, keepdims=True)

    contrib = ce_row + cr_weight * kl_row                        # (TB, 1)

    if needs_mask:
        row = jax.lax.broadcasted_iota(jnp.int32, contrib.shape, 0)
        global_row = p * part_rows + i * block_rows + row
        contrib = jnp.where(global_row < batch, contrib, 0.0)

    acc_ref[0] = acc_ref[0] + jnp.sum(contrib)

    @pl.when(i == pl.num_programs(1) - 1)
    def _():
        # Broadcast the partial into this core's (1, 8, 128) output slab.
        out_ref[...] = jnp.full(out_ref.shape, acc_ref[0], jnp.float32)


def _pick_block_rows(batch, num_classes, itemsize):
    """VMEM-aware batch tile: 2 streams x 2 pipeline buffers under budget."""
    per_row_bytes = 2 * 2 * num_classes * itemsize
    tb = _LOGITS_TILE_BUDGET // per_row_bytes
    tb = max(8, min(int(tb), 4096))
    # No point tiling finer than one half-batch per partial.
    half = -(-batch // _NUM_PARTIALS)
    half8 = max(8, -(-half // 8) * 8)
    tb = min(tb, half8)
    return max(8, (tb // 8) * 8)


def consistency_regularization_loss(preds_w, preds_s, target, *,
                                    cr_loss_weight=CR_LOSS_WEIGHT,
                                    block_rows=None):
    """Scalar loss. preds_*: (B, C) float logits; target: (B,) int labels."""
    B, C = preds_w.shape

    # bf16 ingestion halves HBM traffic on this mem-bound kernel (math stays f32).
    if preds_w.dtype == jnp.float32:
        preds_w = preds_w.astype(jnp.bfloat16)
    if preds_s.dtype == jnp.float32:
        preds_s = preds_s.astype(jnp.bfloat16)
    itemsize = max(jnp.dtype(preds_w.dtype).itemsize,
                   jnp.dtype(preds_s.dtype).itemsize)

    if block_rows is None:
        block_rows = _pick_block_rows(B, C, itemsize)
    assert block_rows % 8 == 0 and block_rows >= 8, "block_rows must be a multiple of 8"
    tb = block_rows

    n_inner = pl.cdiv(B, _NUM_PARTIALS * tb)
    part_rows = n_inner * tb
    b_pad = _NUM_PARTIALS * part_rows
    needs_mask = b_pad != B

    tgt = target.astype(jnp.int32).reshape(B, 1)
    if needs_mask:
        pad = b_pad - B
        preds_w = jnp.pad(preds_w, ((0, pad), (0, 0)))
        preds_s = jnp.pad(preds_s, ((0, pad), (0, 0)))
        tgt = jnp.pad(tgt, ((0, pad), (0, 0)))

    # Explicit scoped-VMEM limit sized to the chosen tiles (+ headroom).
    tiles_bytes = 2 * 2 * tb * C * itemsize + 2 * tb * 4 + 2 * 8 * 128 * 4
    vmem_limit = max(int(1.5 * tiles_bytes) + (2 << 20), 32 << 20)

    cost = pl.CostEstimate(
        flops=12 * b_pad * C,
        transcendentals=2 * b_pad * C,
        bytes_accessed=2 * b_pad * C * itemsize + b_pad * 4
        + _NUM_PARTIALS * 8 * 128 * 4,
    )

    kernel = functools.partial(
        _cr_loss_kernel,
        cr_weight=float(cr_loss_weight),
        batch=B,
        part_rows=part_rows,
        block_rows=tb,
        needs_mask=needs_mask,
    )

    out = pl.pallas_call(
        kernel,
        out_shape=jax.ShapeDtypeStruct((_NUM_PARTIALS, 8, 128), jnp.float32),
        grid_spec=pltpu.PrefetchScalarGridSpec(
            num_scalar_prefetch=0,
            grid=(_NUM_PARTIALS, n_inner),
            in_specs=[
                pl.BlockSpec((tb, C), lambda p, i: (p * n_inner + i, 0)),  # weak
                pl.BlockSpec((tb, C), lambda p, i: (p * n_inner + i, 0)),  # strong
                pl.BlockSpec((tb, 1), lambda p, i: (p * n_inner + i, 0)),  # targets
            ],
            out_specs=pl.BlockSpec((1, 8, 128), lambda p, i: (p, 0, 0)),
            scratch_shapes=[pltpu.SMEM((1,), jnp.float32)],
        ),
        compiler_params=pltpu.CompilerParams(
            dimension_semantics=("parallel", "arbitrary"),
            vmem_limit_bytes=vmem_limit,
        ),
        cost_estimate=cost,
    )(preds_w, preds_s, tgt)

    partials = out[:, 0, 0]                 # one partial sum per parallel slice
    return jnp.sum(partials) / B


def _reference(preds_w, preds_s, target, num_classes):
    # Pure-JAX reference mirroring the PyTorch forward (math in f32).
    log_p_w = jax.nn.log_softmax(preds_w.astype(jnp.float32), axis=-1)
    p_w = jnp.exp(log_p_w)
    log_p_s = jax.nn.log_softmax(preds_s.astype(jnp.float32), axis=-1)
    onehot = jax.nn.one_hot(target, num_classes, dtype=jnp.float32)
    first_loss = jnp.mean(-jnp.sum(onehot * log_p_w, axis=-1))
    cr_loss = jnp.mean(jnp.sum(p_w * (log_p_w - log_p_s), axis=-1))
    return first_loss + CR_LOSS_WEIGHT * cr_loss


if __name__ == "__main__":
    key = jax.random.PRNGKey(0)
    k1, k2, k3, k4, k5, k6 = jax.random.split(key, 6)

    # Case 1: even batch (no padding path), exercises the 2-partial split.
    B, C = 32, 128
    preds_w = jax.random.normal(k1, (B, C), dtype=jnp.float32).astype(jnp.bfloat16)
    preds_s = jax.random.normal(k2, (B, C), dtype=jnp.float32).astype(jnp.bfloat16)
    target = jax.random.randint(k3, (B,), 0, C, dtype=jnp.int32)

    loss = jax.block_until_ready(
        consistency_regularization_loss(preds_w, preds_s, target))
    ref = jax.block_until_ready(_reference(preds_w, preds_s, target, C))
    assert jnp.allclose(loss, ref, rtol=1e-4, atol=1e-5), (loss, ref)

    # Case 2: ragged batch (forces padding + in-kernel row masking).
    B2 = 20
    preds_w2 = jax.random.normal(k4, (B2, C), dtype=jnp.float32).astype(jnp.bfloat16)
    preds_s2 = jax.random.normal(k5, (B2, C), dtype=jnp.float32).astype(jnp.bfloat16)
    target2 = jax.random.randint(k6, (B2,), 0, C, dtype=jnp.int32)

    loss2 = jax.block_until_ready(
        consistency_regularization_loss(preds_w2, preds_s2, target2))
    ref2 = jax.block_until_ready(_reference(preds_w2, preds_s2, target2, C))
    assert jnp.allclose(loss2, ref2, rtol=1e-4, atol=1e-5), (loss2, ref2)

    print("KERNEL_OK")
</pallas_src>

<mosaic_0001>
module attributes {stable_mosaic.version = 11 : i64} {
  func.func @_cr_loss_kernel(%arg0: i32, %arg1: i32, %arg2: memref<16x128xbf16, #tpu.memory_space<vmem>>, %arg3: memref<16x128xbf16, #tpu.memory_space<vmem>>, %arg4: memref<16x1xi32, #tpu.memory_space<vmem>>, %arg5: memref<1x8x128xf32, #tpu.memory_space<vmem>>, %arg6: memref<1xf32, #tpu.memory_space<smem>>) attributes {dimension_semantics = [#tpu.dimension_semantics<parallel>, #tpu.dimension_semantics<arbitrary>], iteration_bounds = array<i64: 2, 1>, scalar_prefetch = 0 : i64, scratch_operands = 1 : i64, tpu.core_type = #tpu.core_type<tc>, window_params = [{transform_indices = @transform_0, window_bounds = array<i64: 16, 128>}, {transform_indices = @transform_1, window_bounds = array<i64: 16, 128>}, {transform_indices = @transform_2, window_bounds = array<i64: 16, 1>}, {transform_indices = @transform_3, window_bounds = array<i64: 1, 8, 128>}]} {
    %c0_i32 = arith.constant 0 : i32
    %0 = arith.cmpi eq, %arg1, %c0_i32 : i32
    %1 = arith.extui %0 : i1 to i32
    %c0_i32_0 = arith.constant 0 : i32
    %2 = arith.cmpi ne, %1, %c0_i32_0 : i32
    scf.if %2 {
      %cst_19 = arith.constant 0.000000e+00 : f32
      %c0_20 = arith.constant 0 : index
      %56 = memref.load %arg6[%c0_20] : memref<1xf32, #tpu.memory_space<smem>>
      memref.store %cst_19, %arg6[%c0_20] : memref<1xf32, #tpu.memory_space<smem>>
    } else {
    }
    %c0 = arith.constant 0 : index
    %c0_1 = arith.constant 0 : index
    %3 = vector.load %arg2[%c0, %c0_1] : memref<16x128xbf16, #tpu.memory_space<vmem>>, vector<16x128xbf16>
    %4 = arith.extf %3 : vector<16x128xbf16> to vector<16x128xf32>
    %c0_2 = arith.constant 0 : index
    %c0_3 = arith.constant 0 : index
    %5 = vector.load %arg3[%c0_2, %c0_3] : memref<16x128xbf16, #tpu.memory_space<vmem>>, vector<16x128xbf16>
    %6 = arith.extf %5 : vector<16x128xbf16> to vector<16x128xf32>
    %c0_4 = arith.constant 0 : index
    %c0_5 = arith.constant 0 : index
    %7 = vector.load %arg4[%c0_4, %c0_5] : memref<16x1xi32, #tpu.memory_space<vmem>>, vector<16x1xi32>
    %cst = arith.constant dense<0xFF800000> : vector<16xf32>
    %8 = vector.multi_reduction <maximumf>, %4, %cst [1] : vector<16x128xf32> to vector<16xf32>
    %9 = vector.shape_cast %8 : vector<16xf32> to vector<16x1xf32>
    %10 = vector.broadcast %9 : vector<16x1xf32> to vector<16x128xf32>
    %11 = arith.subf %4, %10 : vector<16x128xf32>
    %12 = math.exp %11 : vector<16x128xf32>
    %cst_6 = arith.constant dense<0.000000e+00> : vector<16xf32>
    %13 = vector.multi_reduction <add>, %12, %cst_6 [1] : vector<16x128xf32> to vector<16xf32>
    %14 = vector.shape_cast %13 : vector<16xf32> to vector<16x1xf32>
    %15 = math.log %14 : vector<16x1xf32>
    %16 = vector.broadcast %15 : vector<16x1xf32> to vector<16x128xf32>
    %17 = arith.subf %11, %16 : vector<16x128xf32>
    %18 = vector.broadcast %14 : vector<16x1xf32> to vector<16x128xf32>
    %19 = arith.divf %12, %18 : vector<16x128xf32>
    %cst_7 = arith.constant dense<0xFF800000> : vector<16xf32>
    %20 = vector.multi_reduction <maximumf>, %6, %cst_7 [1] : vector<16x128xf32> to vector<16xf32>
    %21 = vector.shape_cast %20 : vector<16xf32> to vector<16x1xf32>
    %22 = vector.broadcast %21 : vector<16x1xf32> to vector<16x128xf32>
    %23 = arith.subf %6, %22 : vector<16x128xf32>
    %24 = math.exp %23 : vector<16x128xf32>
    %cst_8 = arith.constant dense<0.000000e+00> : vector<16xf32>
    %25 = vector.multi_reduction <add>, %24, %cst_8 [1] : vector<16x128xf32> to vector<16xf32>
    %26 = vector.shape_cast %25 : vector<16xf32> to vector<16x1xf32>
    %27 = math.log %26 : vector<16x1xf32>
    %28 = vector.broadcast %27 : vector<16x1xf32> to vector<16x128xf32>
    %29 = arith.subf %23, %28 : vector<16x128xf32>
    %30 = tpu.iota {dimensions = array<i32: 1>} : vector<16x128xi32>
    %31 = vector.broadcast %7 : vector<16x1xi32> to vector<16x128xi32>
    %32 = arith.cmpi eq, %30, %31 : vector<16x128xi32>
    %cst_9 = arith.constant 0.000000e+00 : f32
    %33 = vector.broadcast %cst_9 : f32 to vector<16x128xf32>
    %34 = arith.select %32, %17, %33 : vector<16x128xi1>, vector<16x128xf32>
    %cst_10 = arith.constant dense<0.000000e+00> : vector<16xf32>
    %35 = vector.multi_reduction <add>, %34, %cst_10 [1] : vector<16x128xf32> to vector<16xf32>
    %36 = vector.shape_cast %35 : vector<16xf32> to vector<16x1xf32>
    %cst_11 = arith.constant 0.000000e+00 : f32
    %37 = vector.broadcast %cst_11 : f32 to vector<16x1xf32>
    %38 = arith.subf %37, %36 : vector<16x1xf32>
    %39 = arith.subf %17, %29 : vector<16x128xf32>
    %40 = arith.mulf %19, %39 : vector<16x128xf32>
    %cst_12 = arith.constant dense<0.000000e+00> : vector<16xf32>
    %41 = vector.multi_reduction <add>, %40, %cst_12 [1] : vector<16x128xf32> to vector<16xf32>
    %42 = vector.shape_cast %41 : vector<16xf32> to vector<16x1xf32>
    %cst_13 = arith.constant 5.000000e-01 : f32
    %43 = vector.broadcast %cst_13 : f32 to vector<16x1xf32>
    %44 = arith.mulf %43, %42 : vector<16x1xf32>
    %45 = arith.addf %38, %44 : vector<16x1xf32>
    %c0_14 = arith.constant 0 : index
    %46 = memref.load %arg6[%c0_14] : memref<1xf32, #tpu.memory_space<smem>>
    %47 = vector.shape_cast %45 : vector<16x1xf32> to vector<1x16x1xf32>
    %cst_15 = arith.constant dense<0.000000e+00> : vector<1xf32>
    %48 = vector.multi_reduction <add>, %47, %cst_15 [1, 2] : vector<1x16x1xf32> to vector<1xf32>
    %49 = vector.shape_cast %48 : vector<1xf32> to vector<1x1x1xf32>
    %50 = vector.extract %49[0, 0, 0] : f32 from vector<1x1x1xf32>
    %51 = arith.addf %46, %50 : f32
    %c0_16 = arith.constant 0 : index
    %52 = memref.load %arg6[%c0_16] : memref<1xf32, #tpu.memory_space<smem>>
    memref.store %51, %arg6[%c0_16] : memref<1xf32, #tpu.memory_space<smem>>
    %c0_i32_17 = arith.constant 0 : i32
    %53 = arith.cmpi eq, %arg1, %c0_i32_17 : i32
    %54 = arith.extui %53 : i1 to i32
    %c0_i32_18 = arith.constant 0 : i32
    %55 = arith.cmpi ne, %54, %c0_i32_18 : i32
    scf.if %55 {
      %c0_19 = arith.constant 0 : index
      %56 = memref.load %arg6[%c0_19] : memref<1xf32, #tpu.memory_space<smem>>
      %57 = vector.broadcast %56 : f32 to vector<1x8x128xf32>
      %c0_20 = arith.constant 0 : index
      %c0_21 = arith.constant 0 : index
      %c0_22 = arith.constant 0 : index
      %58 = vector.load %arg5[%c0_20, %c0_21, %c0_22] : memref<1x8x128xf32, #tpu.memory_space<vmem>>, vector<1x8x128xf32>
      tpu.vector_store %arg5[%c0_20, %c0_21, %c0_22], %57 {strides = array<i32>} : memref<1x8x128xf32, #tpu.memory_space<vmem>>, vector<1x8x128xf32>,
    } else {
    }
    return
  }
  func.func @transform_0(%arg0: i32, %arg1: i32) -> (i32, i32) {
    %c1_i32 = arith.constant 1 : i32
    %0 = arith.muli %arg0, %c1_i32 : i32
    %1 = arith.addi %0, %arg1 : i32
    %c0_i32 = arith.constant 0 : i32
    %c0_i32_0 = arith.constant 0 : i32
    return %1, %c0_i32 : i32, i32
  }
  func.func @transform_1(%arg0: i32, %arg1: i32) -> (i32, i32) {
    %c1_i32 = arith.constant 1 : i32
    %0 = arith.muli %arg0, %c1_i32 : i32
    %1 = arith.addi %0, %arg1 : i32
    %c0_i32 = arith.constant 0 : i32
    %c0_i32_0 = arith.constant 0 : i32
    return %1, %c0_i32 : i32, i32
  }
  func.func @transform_2(%arg0: i32, %arg1: i32) -> (i32, i32) {
    %c1_i32 = arith.constant 1 : i32
    %0 = arith.muli %arg0, %c1_i32 : i32
    %1 = arith.addi %0, %arg1 : i32
    %c0_i32 = arith.constant 0 : i32
    %c0_i32_0 = arith.constant 0 : i32
    return %1, %c0_i32 : i32, i32
  }
  func.func @transform_3(%arg0: i32, %arg1: i32) -> (i32, i32, i32) {
    %c0_i32 = arith.constant 0 : i32
    %c0_i32_0 = arith.constant 0 : i32
    %c0_i32_1 = arith.constant 0 : i32
    return %arg0, %c0_i32, %c0_i32_0 : i32, i32, i32
  }
}

</mosaic_0001>

<bundles_post_ra>
// kernel: tpu_custom_call.1
= control target key start
LH: loop header
LB: loop body
LE: loop exit
PB: predicated region body
PF: predicated region fallthrough
CT: control target
= control target key end

     0   :  { %8 = vsyncpa [#allocation4], 0  ;;  %s797_s0 = inlined_call_operand.vmem [shape: bf16[32,128], index: 0, kind: input, shape index: {}]   ;;  %s798_s1 = inlined_call_operand.vmem [shape: bf16[32,128], index: 1, kind: input, shape index: {}]   ;;  %s799_s2 = inlined_call_operand.vmem [shape: s32[32,1], index: 2, kind: input, shape index: {}]   ;;  %s800_s3 = inlined_call_operand.hbm [shape: f32[2,8,128], index: 3, kind: output, shape index: {}]  }
   0x1   :  { %10 = vsyncpa [#allocation4 + $0x1], 0  ;;  %s672_s12 = smov 0   ;;  %s674_s13 = smov 0  }
   0x2   :  { %s676_s14 = smov 0   ;;  %s678_s15 = smov 0  }
   0x3   :  { %s680_s16 = smov 0   ;;  %s682_s17 = smov 0  }
   0x4 LB: > { %s466_s18 = sadd.s32 4294967295, %s648_s17   ;;  %s467_s19 = sadd.s32 4294967294, %s648_s17   ;;  %s648_s17 = sphi %s682_s17, %s16_s17   ;;  %s644_s16 = sphi %s680_s16, %s807_s16   ;;  %s640_s15 = sphi %s678_s15, %s806_s15   ;;  %s636_s14 = sphi %s676_s14, %s805_s14   ;;  %s632_s13 = sphi %s674_s13, %s804_s13   ;;  %s628_s12 = sphi %s672_s12, %s803_s12  }
   0x5   : > { %s28_s20 = sadd.s32 1, %s644_s16  ;;  %s119_s21 = sadd.s32 1, %s636_s14 }
   0x6   : > { %p30_p0 = scmp.ge.s32.totalorder %s28_s20, 2  ;;  %p129_p1 = scmp.ne.s32.totalorder %s636_s14, %s632_s13 }
   0x7   : > { %p130_p2 = scmp.eq.s32.totalorder %s466_s18, 1  ;;  %p135_p3 = scmp.ne.s32.totalorder %s632_s13, %s628_s12 }
   0x8   : > { %s809_s20 = smov (%p30_p0, %s28_s20), 0  ;;  %p136_p5 = scmp.eq.s32.totalorder %s467_s19, 1 }
   0x9   : > { %p712_p4 = por %p130_p2, %p129_p1  ;;  %s116_s23 = ssub.s32 %s644_s16, %s809_s20 }
   0xa   : > { %p470_p6 = scmp.ge.s32.totalorder %s648_s17, 1  ;;  %p117_p7 = scmp.eq.s32.totalorder %s116_s23, 0 }
   0xb   : > { %p719_p8 = por %p136_p5, %p135_p3  ;;  %p187_p9 = scmp.lt.s32.totalorder %s648_s17, 3 }
   0xc   : > { %s725_s25 = scalar_select %p117_p7, %s636_s14, %s119_s21  }
   0xd   : > { %p188_p10 = pnand %p470_p6, %p187_p9 }
   0xe   : > { %s472_s26 = sshll.u32 (!%p188_p10), %s640_s15, 1  ;;  %v650_v6 = vmov (!%p188_p10), 0   ;;  %v308_v28 = vlaneseq (!%p188_p10)  ;;  %vm339_vm2 = vcmask (!%p188_p10), 7168   ;;  %s221_s11 = sand.u32 (!%p188_p10), 1, %s632_s13  }
   0xf   : > { %191 = sbr.rel (%p188_p10) target bundleno = 723 (0x2d3), region = 32  ;;  %p226_p11 = scmp.lt.s32.totalorder (!%p188_p10), %s472_s26, 3  ;;  %548 = vset.pattern.permute.xlu0 (!%p188_p10), %v650_v6  ;;  %549 = vset.pattern.permute.xlu1 (!%p188_p10), %v650_v6 }
  0x10   : > { %v309_v30 = vand.u32 (!%p188_p10), 127, %v308_v28  ;;  %s471_s18 = sshll.u32 (!%p188_p10), %s221_s11, 3  ;;  %s479_s23 = sshll.u32 (!%p188_p10), %s640_s15, 7 }
  0x11   : > { %s223_s19 = scalar_lea.vmem (!%p188_p10), [#allocation3], %s471_s18  ;;  %s752_s29 = scalar_lea.hbm (!%p188_p10), %s800_s3, %s479_s23 }
  0x12   : > { %s375_s21 = sshll.u32 (!%p188_p10), %s223_s19, 4  ;;  %s651_s15 = smov (!%p188_p10), [#allocation3]   ;;  %s747_s21 = int_to_ptr.vmem [resolvable:$true] %s375_s21 }
  0x13   : > { %s570_s4 = scalar_lea.vmem (!%p188_p10), %s747_s21, 128  ;;  %s574_s5 = sshll.u32 (!%p188_p10), %s651_s15, 4  ;;  %s575_s5 = int_to_ptr.vmem [resolvable:$false] %s574_s5 }
  0x14   : > { %p571_p12 = scmp.ne.s32.totalorder (!%p188_p10), %s747_s21, %s570_s4  ;;  %p577_p1 = scmp.lt.s32.totalorder (!%p188_p10), %s747_s21, %s575_s5 }
  0x16   : > { %s811_s26 = smov (!%p226_p11, %s472_s26), 3  ;;  %p572_p13 = pnand %p571_p12, %p712_p4 }
  0x17   : > { %s473_s27 = sshll.u32 %s811_s26, 2  ;;  %s477_s7 = sshll.u32 %s811_s26, 3 }
  0x18   : > { %s229_s30 = scalar_lea.vmem %s797_s0, %s473_s27  ;;  %s237_s6 = scalar_lea.vmem %s798_s1, %s473_s27 }
  0x19   : > { %v483_v0 = vld [vmem:[%s229_s30] sm:$0xff]   ;;  %s245_s10 = scalar_lea.vmem %s799_s2, %s477_s7  ;;  %s362_s30 = scalar_lea.sflag [#allocation4], %s221_s11 }
  0x1a   : > { %v487_v1 = vld [vmem:[%s237_s6] sm:$0xff]   ;;  %v484_v2 = vunpack.c.l.bf16 %v483_v0  ;;  %v485_v4 = vunpack.c.h.bf16 %v483_v0  ;;  %v263_v23 = vld [vmem:[%s245_s10 + $0x8] sm:$0xff]  ;;  %p573_p0 = pneg %p572_p13  ;;  %s576_s6 = scalar_lea.vmem %s575_s5, 256 }
  0x1b   : > { %v488_v3 = vunpack.c.l.bf16 %v487_v1  ;;  %v489_v5 = vunpack.c.h.bf16 %v487_v1  ;;  %v262_v24 = vld [vmem:[%s245_s10] sm:$0xff]  ;;  %p578_p2 = scmp.lt.s32.totalorder %s576_s6, %s570_s4 }
  0x1c   : > { %264 = vmax.xlane.f32.xlu0 %v484_v2 }
  0x1d   : > { %288 = vmax.xlane.f32.xlu1 %v488_v3  ;;  %p579_p3 = por %p578_p2, %p577_p1 }
  0x1f   : > { %p580_p5 = pnand %p579_p3, %p573_p0 }
  0x20   : > { %266 = vmax.xlane.f32.xlu0 %v485_v4 }
  0x21   : > { %290 = vmax.xlane.f32.xlu1 %v489_v5 }
  0xa9   : > { %v265_v7 = vpop.xlane.xlu0 %264 }
  0xaa   : > { %v289_v8 = vpop.xlane.xlu1 %288  ;;  %v268_v9 = vsub.f32 %v484_v2, %v265_v7 }
  0xab   : > { %v737_v10 = vsub.f32 %v488_v3, %v289_v8 }
  0xac   : > { %v270_v11 = vmul.f32 1.442695, %v268_v9 }
  0xad   : > { %v294_v12 = vmul.f32 1.442695, %v737_v10  ;;  %v267_v13 = vpop.xlane.xlu0 %266 }
  0xae   : > { %v291_v14 = vpop.xlane.xlu1 %290  ;;  %550 = vpow2.f32 %v270_v11  ;;  %v269_v15 = vsub.f32 %v485_v4, %v267_v13 }
  0xaf   : > { %v293_v16 = vsub.f32 %v489_v5, %v291_v14  ;;  %552 = vpow2.f32 %v294_v12 }
  0xb0   : > { %v272_v17 = vmul.f32 1.442695, %v269_v15 }
  0xb1   : > { %v296_v18 = vmul.f32 1.442695, %v293_v16 }
  0xb2   : > { %554 = vpow2.f32 %v272_v17 }
  0xb3   : > { %556 = vpow2.f32 %v296_v18 }
  0xb8   : > { %v551_v19 = vpop.eup %550 }
  0xb9   : > { %274 = vadd.xlane.f32.xlu0 %v551_v19  ;;  %v553_v20 = vpop.eup %552 }
  0xbc   : > { %v555_v21 = vpop.eup %554 }
  0xbd   : > { %298 = vadd.xlane.f32.xlu0 %v553_v20  ;;  %276 = vadd.xlane.f32.xlu1 %v555_v21  ;;  %v557_v22 = vpop.eup %556 }
  0xc1   : > { %300 = vadd.xlane.f32.xlu1 %v557_v22 }
  0xd2   : > { %314 = vperm.xlu1 %549, %v263_v23  }
  0xd3   : > { %311 = vperm.xlu0 %548, %v262_v24  }
 0x146   : > { %v275_v25 = vpop.xlane.xlu0 %274 }
 0x147   : > { %558 = vlog2.f32 %v275_v25 }
 0x14a   : > { %v277_v26 = vpop.xlane.xlu1 %276  ;;  %v299_v27 = vpop.xlane.xlu0 %298 }
 0x14b   : > { %560 = vlog2.f32 %v277_v26 }
 0x14c   : > { %562 = vlog2.f32 %v299_v27 }
 0x14d   : > { %564 = vrcp.f32 %v275_v25 }
 0x14e   : > { %v301_v29 = vpop.xlane.xlu1 %300 }
 0x14f   : > { %566 = vlog2.f32 %v301_v29 }
 0x150   : > { %568 = vrcp.f32 %v277_v26 }
 0x151   : > { %v559_v31 = vpop.eup %558 }
 0x152   : > { %v312_v32 = vpop.permute.xlu0 %311  ;;  %v279_v33 = vmul.f32 0.6931472, %v559_v31  ;;  %v315_v35 = vpop.permute.xlu1 %314 }
 0x153   : > { %vm316_vm0 = vcmp.eq.s32.totalorder %v309_v30, %v312_v32  ;;  %vm317_vm1 = vcmp.eq.s32.totalorder %v309_v30, %v315_v35 }
 0x154   : > { %v282_v34 = vsub.f32 %v268_v9, %v279_v33 }
 0x155   : > { %v561_v36 = vpop.eup %560 }
 0x156   : > { %v318_v37 = vsel %vm316_vm0, %v282_v34, 0.0  ;;  %v281_v38 = vmul.f32 0.6931472, %v561_v36  ;;  %v563_v39 = vpop.eup %562 }
 0x157   : > { %320 = vadd.xlane.f32.xlu1 %v318_v37  ;;  %v565_v40 = vpop.eup %564  ;;  %v303_v41 = vmul.f32 0.6931472, %v563_v39 }
 0x158   : > { %v283_v42 = vsub.f32 %v269_v15, %v281_v38  ;;  %v285_v49 = vmul.f32 %v565_v40, %v551_v19 }
 0x159   : > { %v567_v43 = vpop.eup %566  ;;  %v306_v44 = vsub.f32 %v737_v10, %v303_v41 }
 0x15a   : > { %v305_v45 = vmul.f32 0.6931472, %v567_v43  ;;  %v319_v46 = vsel %vm317_vm1, %v283_v42, 0.0  ;;  %v569_v47 = vpop.eup %568 }
 0x15b   : > { %322 = vadd.xlane.f32.xlu0 %v319_v46  ;;  %v326_v50 = vsub.f32 %v282_v34, %v306_v44  ;;  %v287_v52 = vmul.f32 %v569_v47, %v555_v21 }
 0x15c   : > { %v307_v48 = vsub.f32 %v293_v16, %v305_v45 }
 0x15d   : > { %v328_v51 = vmul.f32 %v326_v50, %v285_v49 }
 0x15e   : > { %v327_v53 = vsub.f32 %v283_v42, %v307_v48 }
 0x15f   : > { %330 = vadd.xlane.f32.xlu1 %v328_v51 }
 0x160   : > { %v329_v54 = vmul.f32 %v327_v53, %v287_v52 }
 0x163   : > { %332 = vadd.xlane.f32.xlu1 %v329_v54 }
 0x1e4   : > { %v321_v55 = vpop.xlane.xlu1 %320 }
 0x1e5   : > { %v324_v59 = vsub.f32 0.0, %v321_v55 }
 0x1e8   : > { %v323_v58 = vpop.xlane.xlu0 %322 }
 0x1e9   : > { %v325_v61 = vsub.f32 0.0, %v323_v58 }
 0x1ec   : > { %v331_v56 = vpop.xlane.xlu1 %330 }
 0x1ed   : > { %v334_v57 = vmul.f32 0.5, %v331_v56 }
 0x1ef   : > { %v336_v62 = vadd.f32 %v334_v57, %v324_v59 }
 0x1f0   : > { %v333_v60 = vpop.xlane.xlu1 %332 }
 0x1f1   : > { %v335_v63 = vmul.f32 0.5, %v333_v60  ;;  %v340_v1 = vsel %vm339_vm2, %v336_v62, 0.0 }
 0x1f3   : > { %v337_v0 = vadd.f32 %v335_v63, %v325_v61 }
 0x1f5   : > { %v341_v2 = vsel %vm339_vm2, %v337_v0, 0.0 }
 0x1f6   : > { %v342_v3 = vadd.f32 %v341_v2, %v340_v1 }
 0x1f8   : > { %343 = vadd.xlane.f32.xlu1 %v342_v3 }
 0x285   : > { %v344_v4 = vpop.xlane.xlu1 %343 }
 0x286   : > { %v345_v5 = vrot.slane %v344_v4, 4 }
 0x288   : > { %v346_v6 = vadd.f32 %v345_v5, %v344_v4 }
 0x28a   : > { %v347_v7 = vrot.slane %v346_v6, 2 }
 0x28c   : > { %v348_v8 = vadd.f32 %v347_v7, %v346_v6 }
 0x28e   : > { %v349_v9 = vrot.slane %v348_v8, 1 }
 0x290   : > { %v350_v10 = vadd.f32 %v349_v9, %v348_v8 }
 0x292   : > { %490 = vpush %v350_v10 }
 0x2c3   : > { %s491_s26 = spop %490 }
 0x2c4   : > { %v359_v11 = vstv %s491_s26 }
 0x2c5   : > { %360 = vst [vmem:[%s223_s19] sm:$0xff] %v359_v11 }
 0x2c6   : > { %583 = shalt.err (!%p580_p5)
}
 0x2c7   : > { %s584_s7 = scalar_lea.hbm %s752_s29, 128  ;;  %s588_s10 = scalar_lea.hbm %s800_s3, 256 }
 0x2c8   : > { %p585_p6 = scmp.ne.s32.totalorder %s752_s29, %s584_s7  ;;  %p589_p10 = scmp.lt.u32.totalorder %s752_s29, %s800_s3 }
 0x2c9   : > { %p590_p11 = scmp.lt.u32.totalorder %s588_s10, %s584_s7  ;;  %p592_p13 = scmp.lt.u32.totalorder %s584_s7, %s752_s29 }
 0x2ca   : > { %p586_p7 = pnand %p585_p6, %p712_p4 }
 0x2cb   : > { %p591_p12 = por %p590_p11, %p589_p10 }
 0x2cc   : > { %p587_p9 = pneg %p586_p7 }
 0x2cd   : > { %p593_p0 = por %p592_p13, %p591_p12 }
 0x2cf   : > { %p594_p1 = pnand %p593_p0, %p587_p9 }
 0x2d1   : > { %597 = shalt.err (!%p594_p1)
}
 0x2d2   : > { %492 = dma.vmem_to_hbm [thread:$0]  (%p712_p4), %s747_s21, 128, %s752_s29, %s362_s30  }
 0x2d3 PF: > { %p498_p2 = scmp.ge.s32.totalorder %s648_s17, 2  ;;  %s387_s19 = sand.u32 1, %s628_s12  }
 0x2d4   : > { %s388_s23 = scalar_lea.sflag [#allocation4], %s387_s19 }
 0x2d5   : > { %p495_p3 = pnand %p498_p2, %p719_p8 }
 0x2d7   : > { %623 = dma.done.wait (!%p495_p3), %s388_s23, 128  }
 0x2d8   : > { %625 = vsyncadd (!%p495_p3), %s388_s23, 4294967168  ;;  %s16_s17 = sadd.s32 1, %s648_s17   ;;  %s803_s12 = smov %s632_s13 }
 0x2d9   : > { %p13_p5 = scmp.ge.s32.totalorder %s16_s17, 4   ;;  %s804_s13 = smov %s636_s14 }
 0x2da   : > { %s805_s14 = smov %s725_s25  ;;  %s806_s15 = smov %s644_s16 }
 0x2db   : > { %s807_s16 = smov %s809_s20  ;;  %15 = sbr.rel (!%p13_p5) target bundleno = 4 (0x4), region = 83 }
 0x2e2   :  { %393 = vsyncpa [#allocation4], 1 }
 0x2e3   :  { %395 = vsyncpa [#allocation4 + $0x1], 1 }

</bundles_post_ra>
